<compile_context>
chip_gen: v6e
topology: v6e:2x2x1
jax: 0.10.0
libtpu: 0.0.40
codegen_flags: <defaults>
</compile_context>

<pallas_src>
import jax
import jax.numpy as jnp
from jax.experimental import pallas as pl
from jax.experimental.pallas import tpu as pltpu

# -----------------------------------------------------------------------------
# Small synthetic config (consistent with TMScoreHead(c_z, no_bins))
# -----------------------------------------------------------------------------
N_RES = 16
C_Z = 16
NO_BINS = 64

_LANE = 128  # TPU lane width; output columns padded to a multiple of this.


# -----------------------------------------------------------------------------
# Pallas kernel
# -----------------------------------------------------------------------------
def tm_head_kernel(z_ref, w_ref, b_ref, o_ref):
    # Single fused matmul + bias; output tile is lane-dense (multiple of 128).
    o_ref[...] = (
        jnp.dot(z_ref[...], w_ref[...], preferred_element_type=jnp.float32)
        + b_ref[...]
    )


# -----------------------------------------------------------------------------
# Wrapper
# -----------------------------------------------------------------------------
def _pick_row_tile(rows):
    # Biggest tile that divides rows; otherwise a single full-extent block.
    for t in (1024, 512, 256, 128):
        if rows % t == 0:
            return t
    return rows


def tm_score_head(z, w, b):
    """z: [*, N_res, N_res, C_z]; w: [C_z, no_bins]; b: [1, no_bins] (or [no_bins])."""
    *lead, n1, n2, c_z = z.shape
    no_bins = w.shape[1]

    rows = n1 * n2
    for d in lead:
        rows *= d
    z_flat = z.reshape(rows, c_z).astype(jnp.float32)

    # Pad output columns to a multiple of 128 -> unmasked, lane-dense stores.
    out_pad = ((no_bins + _LANE - 1) // _LANE) * _LANE
    w_pad = jnp.zeros((c_z, out_pad), jnp.float32).at[:, :no_bins].set(
        w.astype(jnp.float32))
    b_row = b.reshape(1, no_bins).astype(jnp.float32)
    b_pad = jnp.zeros((1, out_pad), jnp.float32).at[:, :no_bins].set(b_row)

    tile = _pick_row_tile(rows)
    grid = (rows // tile,)

    out = pl.pallas_call(
        tm_head_kernel,
        grid=grid,
        in_specs=[
            pl.BlockSpec((tile, c_z), lambda i: (i, 0)),
            pl.BlockSpec((c_z, out_pad), lambda i: (0, 0)),
            pl.BlockSpec((1, out_pad), lambda i: (0, 0)),
        ],
        out_specs=pl.BlockSpec((tile, out_pad), lambda i: (i, 0)),
        out_shape=jax.ShapeDtypeStruct((rows, out_pad), jnp.float32),
        compiler_params=pltpu.CompilerParams(
            dimension_semantics=("parallel",)),
    )(z_flat, w_pad, b_pad)

    logits = out[:, :no_bins]
    return logits.reshape(*lead, n1, n2, no_bins)


# -----------------------------------------------------------------------------
# Main
# -----------------------------------------------------------------------------
if __name__ == "__main__":
    key = jax.random.PRNGKey(0)
    kz, kw, kb = jax.random.split(key, 3)

    # [N_res, N_res, C_z] pair embedding and TMScoreHead linear params.
    # (The torch module uses init='final' -> zeros; random params exercise the
    #  same forward math while giving non-trivial outputs.)
    z = jax.random.normal(kz, (N_RES, N_RES, C_Z), jnp.float32)
    w = 0.1 * jax.random.normal(kw, (C_Z, NO_BINS), jnp.float32)
    b = 0.1 * jax.random.normal(kb, (1, NO_BINS), jnp.float32)

    logits = tm_score_head(z, w, b)
    logits = jax.block_until_ready(logits)

    # Sanity check against a plain-JAX reference (loose tol: MXU f32 path).
    ref = jnp.einsum("hwc,cn->hwn", z, w) + b.reshape(1, 1, NO_BINS)
    if logits.shape != (N_RES, N_RES, NO_BINS):
        raise SystemExit(f"bad output shape: {logits.shape}")
    if not bool(jnp.allclose(logits, ref, atol=2e-2, rtol=2e-2)):
        raise SystemExit("mismatch vs reference")

    print("KERNEL_OK")
</pallas_src>

<mosaic_0001>
module attributes {stable_mosaic.version = 11 : i64} {
  func.func @tm_head_kernel(%arg0: i32, %arg1: memref<256x16xf32, #tpu.memory_space<vmem>>, %arg2: memref<16x128xf32, #tpu.memory_space<vmem>>, %arg3: memref<1x128xf32, #tpu.memory_space<vmem>>, %arg4: memref<256x128xf32, #tpu.memory_space<vmem>>) attributes {dimension_semantics = [#tpu.dimension_semantics<parallel>], iteration_bounds = array<i64: 1>, scalar_prefetch = 0 : i64, scratch_operands = 0 : i64, tpu.core_type = #tpu.core_type<tc>, window_params = [{transform_indices = @transform_0, window_bounds = array<i64: 256, 16>}, {pipeline_mode = #tpu.pipeline_mode<synchronous>, transform_indices = @transform_1, window_bounds = array<i64: 16, 128>}, {pipeline_mode = #tpu.pipeline_mode<synchronous>, transform_indices = @transform_2, window_bounds = array<i64: 1, 128>}, {transform_indices = @transform_3, window_bounds = array<i64: 256, 128>}]} {
    %c0 = arith.constant 0 : index
    %c0_0 = arith.constant 0 : index
    %0 = vector.load %arg1[%c0, %c0_0] : memref<256x16xf32, #tpu.memory_space<vmem>>, vector<256x16xf32>
    %c0_1 = arith.constant 0 : index
    %c0_2 = arith.constant 0 : index
    %1 = vector.load %arg2[%c0_1, %c0_2] : memref<16x128xf32, #tpu.memory_space<vmem>>, vector<16x128xf32>
    %cst = arith.constant dense<0.000000e+00> : vector<256x128xf32>
    %2 = tpu.matmul %0, %1, %cst {dimension_numbers = #tpu.dot_dimension_numbers<[1], [0], [0], [1], [0, 0, 1, 1], [], []>} : vector<256x16xf32>, vector<16x128xf32>, vector<256x128xf32> -> vector<256x128xf32>
    %c0_3 = arith.constant 0 : index
    %c0_4 = arith.constant 0 : index
    %3 = vector.load %arg3[%c0_3, %c0_4] : memref<1x128xf32, #tpu.memory_space<vmem>>, vector<1x128xf32>
    %4 = vector.broadcast %3 : vector<1x128xf32> to vector<256x128xf32>
    %5 = arith.addf %2, %4 : vector<256x128xf32>
    %c0_5 = arith.constant 0 : index
    %c0_6 = arith.constant 0 : index
    %6 = vector.load %arg4[%c0_5, %c0_6] : memref<256x128xf32, #tpu.memory_space<vmem>>, vector<256x128xf32>
    tpu.vector_store %arg4[%c0_5, %c0_6], %5 {strides = array<i32>} : memref<256x128xf32, #tpu.memory_space<vmem>>, vector<256x128xf32>,
    return
  }
  func.func @transform_0(%arg0: i32) -> (i32, i32) {
    %c0_i32 = arith.constant 0 : i32
    %c0_i32_0 = arith.constant 0 : i32
    return %arg0, %c0_i32 : i32, i32
  }
  func.func @transform_1(%arg0: i32) -> (i32, i32) {
    %c0_i32 = arith.constant 0 : i32
    %c0_i32_0 = arith.constant 0 : i32
    %c0_i32_1 = arith.constant 0 : i32
    return %c0_i32, %c0_i32_0 : i32, i32
  }
  func.func @transform_2(%arg0: i32) -> (i32, i32) {
    %c0_i32 = arith.constant 0 : i32
    %c0_i32_0 = arith.constant 0 : i32
    %c0_i32_1 = arith.constant 0 : i32
    return %c0_i32, %c0_i32_0 : i32, i32
  }
  func.func @transform_3(%arg0: i32) -> (i32, i32) {
    %c0_i32 = arith.constant 0 : i32
    %c0_i32_0 = arith.constant 0 : i32
    return %arg0, %c0_i32 : i32, i32
  }
}

</mosaic_0001>

<bundles_post_ra>
// kernel: tpu_custom_call.1
= control target key start
LH: loop header
LB: loop body
LE: loop exit
PB: predicated region body
PF: predicated region fallthrough
CT: control target
= control target key end

     0   :  { %vm56_vm0 = vcmask 130048   ;;  %s771_s0 = inlined_call_operand.vmem [shape: f32[256,16], index: 0, kind: input, shape index: {}]   ;;  %s772_s1 = inlined_call_operand.vmem [shape: f32[16,128], index: 1, kind: input, shape index: {}]   ;;  %s773_s2 = inlined_call_operand.vmem [shape: f32[1,128], index: 2, kind: input, shape index: {}]   ;;  %s774_s3 = inlined_call_operand.hbm [shape: f32[256,128], index: 3, kind: output, shape index: {}]  }
   0x1   :  { %v48_v0 = vld [vmem:[%s772_s1 + $0x8] sm:$0xff]  ;;  %v47_v1 = vld [vmem:[%s772_s1] sm:$0xff]  ;;  %v17_v6 = vld [vmem:[%s771_s0 + $0x10] sm:$0xff] }
   0x2   :  { %493 = vmatprep.subr.mxu0 %v48_v0  ;;  %545 = vmatprep.subr.mxu1 %v48_v0  ;;  %v15_v2 = vld [vmem:[%s771_s0] sm:$0xff]  ;;  %v16_v4 = vld [vmem:[%s771_s0 + $0x8] sm:$0xff]  ;;  %v33_v7 = vld [vmem:[%s771_s0 + $0x90] sm:$0xff] }
   0x3   :  { %494 = vmatpush3.msra.mxu0 %v48_v0  ;;  %547 = vmatpush3.msra.mxu1 %v48_v0  ;;  %v31_v3 = vld [vmem:[%s771_s0 + $0x80] sm:$0xff]  ;;  %v32_v5 = vld [vmem:[%s771_s0 + $0x88] sm:$0xff]  ;;  %v18_v8 = vld [vmem:[%s771_s0 + $0x18] sm:$0xff] }
   0x4   :  { %495 = vmatprep.subr.mxu0 %v47_v1  ;;  %546 = vmatprep.subr.mxu1 %v47_v1  ;;  %v34_v9 = vld [vmem:[%s771_s0 + $0x98] sm:$0xff]  ;;  %v19_v10 = vld [vmem:[%s771_s0 + $0x20] sm:$0xff]  ;;  %v20_v12 = vld [vmem:[%s771_s0 + $0x28] sm:$0xff] }
   0x5   :  { %496 = vmatpush3.msra.mxu0 %v47_v1  ;;  %548 = vmatpush3.msra.mxu1 %v47_v1  ;;  %v35_v11 = vld [vmem:[%s771_s0 + $0xa0] sm:$0xff]  ;;  %v36_v13 = vld [vmem:[%s771_s0 + $0xa8] sm:$0xff] }
   0x6   :  { %497 = vmatprep.mubr.msk.f32.mxu0 %vm56_vm0, %v15_v2  ;;  %521 = vmatprep.mubr.msk.f32.mxu1 %vm56_vm0, %v31_v3 }
   0x7   :  { %498 = vmatmul.mubr.msk.f32.vlgmr.msra.gmra.mxu0 %vm56_vm0, %v16_v4  ;;  %522 = vmatmul.mubr.msk.f32.vlgmr.msra.gmra.mxu1 %vm56_vm0, %v32_v5 }
   0x8   :  { %500 = vmatprep.mubr.msk.f32.mxu0 %vm56_vm0, %v17_v6  ;;  %524 = vmatprep.mubr.msk.f32.mxu1 %vm56_vm0, %v33_v7 }
   0xb   :  { %501 = vmatmul.mubr.msk.f32.gmra.mxu0 %vm56_vm0, %v18_v8  ;;  %525 = vmatmul.mubr.msk.f32.gmra.mxu1 %vm56_vm0, %v34_v9 }
   0xc   :  { %503 = vmatprep.mubr.msk.f32.mxu0 %vm56_vm0, %v19_v10  ;;  %527 = vmatprep.mubr.msk.f32.mxu1 %vm56_vm0, %v35_v11 }
   0xd   :  { %8 = vsyncpa [#allocation3], 0  ;;  %v21_v14 = vld [vmem:[%s771_s0 + $0x30] sm:$0xff]  ;;  %v22_v16 = vld [vmem:[%s771_s0 + $0x38] sm:$0xff] }
   0xe   :  { %v37_v15 = vld [vmem:[%s771_s0 + $0xb0] sm:$0xff]  ;;  %v38_v17 = vld [vmem:[%s771_s0 + $0xb8] sm:$0xff]  ;;  %v23_v18 = vld [vmem:[%s771_s0 + $0x40] sm:$0xff] }
   0xf   :  { %504 = vmatmul.mubr.msk.f32.gmra.mxu0 %vm56_vm0, %v20_v12  ;;  %528 = vmatmul.mubr.msk.f32.gmra.mxu1 %vm56_vm0, %v36_v13  ;;  %v39_v19 = vld [vmem:[%s771_s0 + $0xc0] sm:$0xff]  ;;  %v24_v20 = vld [vmem:[%s771_s0 + $0x48] sm:$0xff]  ;;  %v25_v22 = vld [vmem:[%s771_s0 + $0x50] sm:$0xff] }
  0x10   :  { %506 = vmatprep.mubr.msk.f32.mxu0 %vm56_vm0, %v21_v14  ;;  %530 = vmatprep.mubr.msk.f32.mxu1 %vm56_vm0, %v37_v15  ;;  %v40_v21 = vld [vmem:[%s771_s0 + $0xc8] sm:$0xff]  ;;  %v41_v23 = vld [vmem:[%s771_s0 + $0xd0] sm:$0xff]  ;;  %v26_v24 = vld [vmem:[%s771_s0 + $0x58] sm:$0xff] }
  0x11   :  { %v42_v25 = vld [vmem:[%s771_s0 + $0xd8] sm:$0xff]  ;;  %v27_v26 = vld [vmem:[%s771_s0 + $0x60] sm:$0xff]  ;;  %v28_v28 = vld [vmem:[%s771_s0 + $0x68] sm:$0xff] }
  0x12   :  { %v43_v27 = vld [vmem:[%s771_s0 + $0xe0] sm:$0xff]  ;;  %v44_v29 = vld [vmem:[%s771_s0 + $0xe8] sm:$0xff]  ;;  %v29_v30 = vld [vmem:[%s771_s0 + $0x70] sm:$0xff] }
  0x13   :  { %507 = vmatmul.mubr.msk.f32.gmra.mxu0 %vm56_vm0, %v22_v16  ;;  %531 = vmatmul.mubr.msk.f32.gmra.mxu1 %vm56_vm0, %v38_v17  ;;  %v45_v31 = vld [vmem:[%s771_s0 + $0xf0] sm:$0xff]  ;;  %v30_v32 = vld [vmem:[%s771_s0 + $0x78] sm:$0xff]  ;;  %v734_v34 = vld [vmem:[%s773_s2] ss:$0 sm:$0xff] }
  0x14   :  { %509 = vmatprep.mubr.msk.f32.mxu0 %vm56_vm0, %v23_v18  ;;  %533 = vmatprep.mubr.msk.f32.mxu1 %vm56_vm0, %v39_v19  ;;  %v46_v33 = vld [vmem:[%s771_s0 + $0xf8] sm:$0xff]  ;;  %s574_s0 = smov [#allocation2]  }
  0x15   :  { %s415_s2 = sshll.u32 %s574_s0, 4  ;;  %s416_s2 = int_to_ptr.vmem [resolvable:$true] %s415_s2 }
  0x16   :  { %s552_s25 = scalar_lea.vmem %s416_s2, 4096  ;;  %p557_p1 = scmp.lt.s32.totalorder %s416_s2, %s416_s2 }
  0x17   :  { %510 = vmatmul.mubr.msk.f32.gmra.mxu0 %vm56_vm0, %v24_v20  ;;  %534 = vmatmul.mubr.msk.f32.gmra.mxu1 %vm56_vm0, %v40_v21  ;;  %p553_p0 = scmp.ne.s32.totalorder %s416_s2, %s552_s25  ;;  %p558_p2 = scmp.lt.s32.totalorder %s552_s25, %s552_s25 }
  0x18   :  { %512 = vmatprep.mubr.msk.f32.mxu0 %vm56_vm0, %v25_v22  ;;  %536 = vmatprep.mubr.msk.f32.mxu1 %vm56_vm0, %v41_v23 }
  0x19   :  { %p559_p3 = por %p558_p2, %p557_p1 }
  0x1b   :  { %513 = vmatmul.mubr.msk.f32.gmra.mxu0 %vm56_vm0, %v26_v24  ;;  %537 = vmatmul.mubr.msk.f32.gmra.mxu1 %vm56_vm0, %v42_v25  ;;  %p560_p4 = pnand %p559_p3, %p553_p0 }
  0x1c   :  { %515 = vmatprep.mubr.msk.f32.mxu0 %vm56_vm0, %v27_v26  ;;  %539 = vmatprep.mubr.msk.f32.mxu1 %vm56_vm0, %v43_v27 }
  0x1f   :  { %516 = vmatmul.mubr.msk.f32.gmra.mxu0 %vm56_vm0, %v28_v28  ;;  %540 = vmatmul.mubr.msk.f32.gmra.mxu1 %vm56_vm0, %v44_v29 }
  0x20   :  { %518 = vmatprep.mubr.msk.f32.mxu0 %vm56_vm0, %v29_v30  ;;  %542 = vmatprep.mubr.msk.f32.mxu1 %vm56_vm0, %v45_v31 }
  0x23   :  { %519 = vmatmul.mubr.msk.f32.gmra.mxu0 %vm56_vm0, %v30_v32  ;;  %543 = vmatmul.mubr.msk.f32.gmra.mxu1 %vm56_vm0, %v46_v33 }
  0xc7   :  { %v499_v35 = vpop.f32.mrf.mxu0  ;;  %v523_v36 = vpop.f32.mrf.mxu1 }
  0xc8   :  { %v225_v37 = vadd.f32 %v499_v35, %v734_v34  ;;  %v305_v38 = vadd.f32 %v523_v36, %v734_v34 }
  0xc9   :  { %v219_v39 = vpop.f32.mrf.mxu0  ;;  %v299_v40 = vpop.f32.mrf.mxu1 }
  0xca   :  { %379 = vst [vmem:[#allocation2 + $0x8] sm:$0xff] %v225_v37  ;;  %395 = vst [vmem:[#allocation2 + $0x88] sm:$0xff] %v305_v38  ;;  %v220_v41 = vadd.f32 %v734_v34, %v219_v39  ;;  %v300_v42 = vadd.f32 %v734_v34, %v299_v40 }
  0xcb   :  { %v502_v43 = vpop.f32.mrf.mxu0  ;;  %v526_v44 = vpop.f32.mrf.mxu1 }
  0xcc   :  { %378 = vst [vmem:[#allocation2] sm:$0xff] %v220_v41  ;;  %394 = vst [vmem:[#allocation2 + $0x80] sm:$0xff] %v300_v42  ;;  %v235_v45 = vadd.f32 %v502_v43, %v734_v34  ;;  %v315_v46 = vadd.f32 %v526_v44, %v734_v34 }
  0xcd   :  { %v229_v47 = vpop.f32.mrf.mxu0  ;;  %v309_v48 = vpop.f32.mrf.mxu1 }
  0xce   :  { %381 = vst [vmem:[#allocation2 + $0x18] sm:$0xff] %v235_v45  ;;  %397 = vst [vmem:[#allocation2 + $0x98] sm:$0xff] %v315_v46  ;;  %v230_v49 = vadd.f32 %v734_v34, %v229_v47  ;;  %v310_v50 = vadd.f32 %v734_v34, %v309_v48 }
  0xcf   :  { %v505_v51 = vpop.f32.mrf.mxu0  ;;  %v529_v52 = vpop.f32.mrf.mxu1 }
  0xd0   :  { %380 = vst [vmem:[#allocation2 + $0x10] sm:$0xff] %v230_v49  ;;  %396 = vst [vmem:[#allocation2 + $0x90] sm:$0xff] %v310_v50  ;;  %v245_v53 = vadd.f32 %v505_v51, %v734_v34  ;;  %v325_v54 = vadd.f32 %v529_v52, %v734_v34 }
  0xd1   :  { %v239_v55 = vpop.f32.mrf.mxu0  ;;  %v319_v56 = vpop.f32.mrf.mxu1 }
  0xd2   :  { %383 = vst [vmem:[#allocation2 + $0x28] sm:$0xff] %v245_v53  ;;  %399 = vst [vmem:[#allocation2 + $0xa8] sm:$0xff] %v325_v54  ;;  %v240_v57 = vadd.f32 %v734_v34, %v239_v55  ;;  %v320_v58 = vadd.f32 %v734_v34, %v319_v56 }
  0xd3   :  { %v508_v59 = vpop.f32.mrf.mxu0  ;;  %v532_v60 = vpop.f32.mrf.mxu1 }
  0xd4   :  { %382 = vst [vmem:[#allocation2 + $0x20] sm:$0xff] %v240_v57  ;;  %398 = vst [vmem:[#allocation2 + $0xa0] sm:$0xff] %v320_v58  ;;  %v255_v61 = vadd.f32 %v508_v59, %v734_v34  ;;  %v335_v62 = vadd.f32 %v532_v60, %v734_v34 }
  0xd5   :  { %v249_v63 = vpop.f32.mrf.mxu0  ;;  %v329_v0 = vpop.f32.mrf.mxu1 }
  0xd6   :  { %385 = vst [vmem:[#allocation2 + $0x38] sm:$0xff] %v255_v61  ;;  %401 = vst [vmem:[#allocation2 + $0xb8] sm:$0xff] %v335_v62  ;;  %v250_v1 = vadd.f32 %v734_v34, %v249_v63  ;;  %v330_v2 = vadd.f32 %v734_v34, %v329_v0 }
  0xd7   :  { %v511_v3 = vpop.f32.mrf.mxu0  ;;  %v535_v4 = vpop.f32.mrf.mxu1 }
  0xd8   :  { %384 = vst [vmem:[#allocation2 + $0x30] sm:$0xff] %v250_v1  ;;  %400 = vst [vmem:[#allocation2 + $0xb0] sm:$0xff] %v330_v2  ;;  %v265_v5 = vadd.f32 %v511_v3, %v734_v34  ;;  %v345_v6 = vadd.f32 %v535_v4, %v734_v34 }
  0xd9   :  { %v259_v7 = vpop.f32.mrf.mxu0  ;;  %v339_v8 = vpop.f32.mrf.mxu1 }
  0xda   :  { %387 = vst [vmem:[#allocation2 + $0x48] sm:$0xff] %v265_v5  ;;  %403 = vst [vmem:[#allocation2 + $0xc8] sm:$0xff] %v345_v6  ;;  %v260_v9 = vadd.f32 %v734_v34, %v259_v7  ;;  %v340_v10 = vadd.f32 %v734_v34, %v339_v8 }
  0xdb   :  { %v514_v11 = vpop.f32.mrf.mxu0  ;;  %v538_v12 = vpop.f32.mrf.mxu1 }
  0xdc   :  { %386 = vst [vmem:[#allocation2 + $0x40] sm:$0xff] %v260_v9  ;;  %402 = vst [vmem:[#allocation2 + $0xc0] sm:$0xff] %v340_v10  ;;  %v275_v13 = vadd.f32 %v514_v11, %v734_v34  ;;  %v355_v14 = vadd.f32 %v538_v12, %v734_v34 }
  0xdd   :  { %v269_v15 = vpop.f32.mrf.mxu0  ;;  %v349_v16 = vpop.f32.mrf.mxu1 }
  0xde   :  { %389 = vst [vmem:[#allocation2 + $0x58] sm:$0xff] %v275_v13  ;;  %405 = vst [vmem:[#allocation2 + $0xd8] sm:$0xff] %v355_v14  ;;  %v270_v17 = vadd.f32 %v734_v34, %v269_v15  ;;  %v350_v18 = vadd.f32 %v734_v34, %v349_v16 }
  0xdf   :  { %v517_v19 = vpop.f32.mrf.mxu0  ;;  %v541_v20 = vpop.f32.mrf.mxu1 }
  0xe0   :  { %388 = vst [vmem:[#allocation2 + $0x50] sm:$0xff] %v270_v17  ;;  %404 = vst [vmem:[#allocation2 + $0xd0] sm:$0xff] %v350_v18  ;;  %v285_v21 = vadd.f32 %v517_v19, %v734_v34  ;;  %v365_v22 = vadd.f32 %v541_v20, %v734_v34 }
  0xe1   :  { %v279_v23 = vpop.f32.mrf.mxu0  ;;  %v359_v24 = vpop.f32.mrf.mxu1 }
  0xe2   :  { %391 = vst [vmem:[#allocation2 + $0x68] sm:$0xff] %v285_v21  ;;  %407 = vst [vmem:[#allocation2 + $0xe8] sm:$0xff] %v365_v22  ;;  %v280_v25 = vadd.f32 %v734_v34, %v279_v23  ;;  %v360_v26 = vadd.f32 %v734_v34, %v359_v24 }
  0xe3   :  { %v520_v27 = vpop.f32.mrf.mxu0  ;;  %v544_v28 = vpop.f32.mrf.mxu1 }
  0xe4   :  { %390 = vst [vmem:[#allocation2 + $0x60] sm:$0xff] %v280_v25  ;;  %406 = vst [vmem:[#allocation2 + $0xe0] sm:$0xff] %v360_v26  ;;  %v295_v29 = vadd.f32 %v520_v27, %v734_v34  ;;  %v375_v30 = vadd.f32 %v544_v28, %v734_v34 }
  0xe5   :  { %v289_v31 = vpop.f32.mrf.mxu0  ;;  %v369_v32 = vpop.f32.mrf.mxu1 }
  0xe6   :  { %393 = vst [vmem:[#allocation2 + $0x78] sm:$0xff] %v295_v29  ;;  %409 = vst [vmem:[#allocation2 + $0xf8] sm:$0xff] %v375_v30  ;;  %v290_v33 = vadd.f32 %v734_v34, %v289_v31  ;;  %v370_v35 = vadd.f32 %v734_v34, %v369_v32 }
  0xe8   :  { %392 = vst [vmem:[#allocation2 + $0x70] sm:$0xff] %v290_v33  ;;  %408 = vst [vmem:[#allocation2 + $0xf0] sm:$0xff] %v370_v35 }
  0xe9   :  { %563 = shalt.err (!%p560_p4)
}
  0xea   :  { %s575_s26 = smov 128   ;;  %s576_s27 = smov 8  }
  0xeb   :  { %421 = dma.vmem_to_hbm [thread:$0]  %s416_s2, 4096, %s774_s3, [#allocation3], %s575_s26, %s575_s26, %s576_s27  }
  0xec   :  { %572 = dma.done.wait [#allocation3], 4096  }
  0xed   :  { %573 = vsyncadd [#allocation3], 4294963200 }
  0xee   :  { %425 = vsyncpa [#allocation3], 1 }

</bundles_post_ra>
